<compile_context>
chip_gen: v7x
topology: tpu7x:2x2x1
jax: 0.10.0
libtpu: 0.0.40
codegen_flags: <defaults>
</compile_context>

<pallas_src>
import functools

import jax
import jax.numpy as jnp
from jax.experimental import pallas as pl
from jax.experimental.pallas import tpu as pltpu

_HIDDEN = 20
_LANES = 128  # everything is padded to full 128-lane tiles


def _rup8(n: int) -> int:
    return -(-n // 8) * 8


def _offsets(sd: int, gd: int, ad: int):
    """Row offsets inside the packed (n_rows, 128) parameter slab."""
    off_x = 0
    off_g = _rup8(sd)
    off_u = off_g + _rup8(gd)
    k1 = off_u + _rup8(ad)        # layer-1 weight rows == concat-activation lanes
    off_w2 = k1
    off_w3 = off_w2 + _LANES      # w2 section padded to 128 rows
    off_b = off_w3 + _LANES       # w3 section padded to 128 rows
    n_rows = off_b + 8            # bias rows (8-row aligned)
    return off_x, off_g, off_u, k1, off_w2, off_w3, off_b, n_rows


def _block_diag(a, b):
    za = jnp.zeros((a.shape[0], b.shape[1]), a.dtype)
    zb = jnp.zeros((b.shape[0], a.shape[1]), b.dtype)
    return jnp.concatenate(
        [jnp.concatenate([a, za], axis=1),
         jnp.concatenate([zb, b], axis=1)], axis=0)


def pack_critic_params(params, state_dim, goal_dim, action_dim, hidden_size=_HIDDEN):
    """Pack the 12 Linear params into one (n_rows, 128) f32 slab. Do this once."""
    (w1, b1, w2, b2, w3, b3, w4, b4, w5, b5, w6, b6) = params
    sd, gd, ad, H = state_dim, goal_dim, action_dim, hidden_size
    assert 2 * H <= _LANES, "fused twin heads must fit in one 128-lane tile"
    off_x, off_g, off_u, k1, off_w2, off_w3, off_b, n_rows = _offsets(sd, gd, ad)

    b1 = jnp.reshape(b1, (1, H)).astype(jnp.float32)
    b2 = jnp.reshape(b2, (1, H)).astype(jnp.float32)
    b3 = jnp.reshape(b3, (1, 1)).astype(jnp.float32)
    b4 = jnp.reshape(b4, (1, H)).astype(jnp.float32)
    b5 = jnp.reshape(b5, (1, H)).astype(jnp.float32)
    b6 = jnp.reshape(b6, (1, 1)).astype(jnp.float32)

    w1f = jnp.concatenate([w1, w4], axis=1).astype(jnp.float32)          # (in, 2H)
    b1f = jnp.concatenate([b1, b4], axis=1)                              # (1, 2H)
    w2f = _block_diag(w2.astype(jnp.float32), w5.astype(jnp.float32))    # (2H, 2H)
    b2f = jnp.concatenate([b2, b5], axis=1)                              # (1, 2H)
    w3f = _block_diag(w3.astype(jnp.float32), w6.astype(jnp.float32))    # (2H, 2)
    b3f = jnp.concatenate([b3, b6], axis=1)                              # (1, 2)

    slab = jnp.zeros((n_rows, _LANES), jnp.float32)
    # Layer-1 rows, split into 8-row-aligned x / g / u sections.
    slab = slab.at[off_x:off_x + sd, :2 * H].set(w1f[:sd])
    slab = slab.at[off_g:off_g + gd, :2 * H].set(w1f[sd:sd + gd])
    slab = slab.at[off_u:off_u + ad, :2 * H].set(w1f[sd + gd:sd + gd + ad])
    # Layer-2 / layer-3 block-diagonal sections (zero-padded to 128x128).
    slab = slab.at[off_w2:off_w2 + 2 * H, :2 * H].set(w2f)
    slab = slab.at[off_w3:off_w3 + 2 * H, :2].set(w3f)
    # Bias rows.
    slab = slab.at[off_b, :2 * H].set(b1f[0])
    slab = slab.at[off_b + 1, :2 * H].set(b2f[0])
    slab = slab.at[off_b + 2, :2].set(b3f[0])
    return slab


def _make_kernel(sd, gd, ad, mode):
    off_x, off_g, off_u, k1, off_w2, off_w3, off_b, _ = _offsets(sd, gd, ad)

    def _q_lanes(x_ref, g_ref, u_ref, p_ref, act_ref):
        # In-kernel concat of [x | g | u] into one activation tile (the zeroed
        # gap lanes line up with zero weight rows in the slab).
        act_ref[...] = jnp.zeros_like(act_ref)
        act_ref[:, off_x:off_x + sd] = x_ref[...]
        act_ref[:, off_g:off_g + gd] = g_ref[...]
        act_ref[:, off_u:off_u + ad] = u_ref[...]

        # Static, fully (8,128)-aligned views into the single VMEM param slab.
        w1 = p_ref[0:k1, :]                      # (k1, 128)
        w2 = p_ref[off_w2:off_w2 + _LANES, :]    # (128, 128) block-diag, zero-padded
        w3 = p_ref[off_w3:off_w3 + _LANES, :]    # (128, 128) q1/q2 in lanes 0/1
        b1 = p_ref[off_b:off_b + 1, :]
        b2 = p_ref[off_b + 1:off_b + 2, :]
        b3 = p_ref[off_b + 2:off_b + 3, :]

        # Single fused layer-1 matmul; heads 1/2 live in lanes [0,H) / [H,2H).
        h = jnp.dot(act_ref[...], w1, preferred_element_type=jnp.float32) + b1
        h = jnp.maximum(h, 0.0)
        h = jnp.dot(h, w2, preferred_element_type=jnp.float32) + b2
        h = jnp.maximum(h, 0.0)
        return jnp.dot(h, w3, preferred_element_type=jnp.float32) + b3

    if mode == "both":
        def kernel(x_ref, g_ref, u_ref, p_ref, q1_ref, q2_ref, act_ref):
            q = _q_lanes(x_ref, g_ref, u_ref, p_ref, act_ref)
            q1_ref[...] = q[:, 0:1].astype(q1_ref.dtype)
            q2_ref[...] = q[:, 1:2].astype(q2_ref.dtype)
    elif mode == "q1":
        def kernel(x_ref, g_ref, u_ref, p_ref, q1_ref, act_ref):
            q = _q_lanes(x_ref, g_ref, u_ref, p_ref, act_ref)
            q1_ref[...] = q[:, 0:1].astype(q1_ref.dtype)
    elif mode == "min":
        def kernel(x_ref, g_ref, u_ref, p_ref, qm_ref, act_ref):
            q = _q_lanes(x_ref, g_ref, u_ref, p_ref, act_ref)
            qm_ref[...] = jnp.minimum(q[:, 0:1], q[:, 1:2]).astype(qm_ref.dtype)
    else:
        raise ValueError(f"unknown mode: {mode}")
    return kernel


def _choose_batch_block(B: int) -> int:
    # Tile the batch only when there is enough work for >= 2 blocks so the
    # "parallel" grid axis can be split across v7x's two TensorCores.
    for tb in (1024, 512, 256):
        if B % tb == 0 and B // tb >= 2:
            return tb
    return B  # single full block (no grid overhead for small batches)


@functools.lru_cache(maxsize=None)
def _build_call(B, sd, gd, ad, mode):
    _, _, _, k1, _, _, _, n_rows = _offsets(sd, gd, ad)
    tb = _choose_batch_block(B)
    nb = B // tb
    n_out = 2 if mode == "both" else 1

    kernel = _make_kernel(sd, gd, ad, mode)

    def batch_spec(d):
        return pl.BlockSpec((tb, d), lambda i: (i, 0))

    slab_spec = pl.BlockSpec((n_rows, _LANES), lambda i: (0, 0))  # resident across grid
    out_spec = pl.BlockSpec((tb, 1), lambda i: (i, 0))
    out_shape_one = jax.ShapeDtypeStruct((B, 1), jnp.float32)

    flops = 2 * B * (k1 * _LANES + 2 * _LANES * _LANES)
    bytes_accessed = 4 * (B * (sd + gd + ad) + n_rows * _LANES + B * n_out)

    return pl.pallas_call(
        kernel,
        out_shape=(tuple(out_shape_one for _ in range(n_out))
                   if n_out == 2 else out_shape_one),
        grid=(nb,),
        in_specs=[batch_spec(sd), batch_spec(gd), batch_spec(ad), slab_spec],
        out_specs=(tuple(out_spec for _ in range(n_out))
                   if n_out == 2 else out_spec),
        scratch_shapes=[pltpu.VMEM((tb, k1), jnp.float32)],
        compiler_params=pltpu.CompilerParams(
            dimension_semantics=("parallel",)),
        cost_estimate=pl.CostEstimate(
            flops=flops, transcendentals=0, bytes_accessed=bytes_accessed),
    )


def _critic_call(x, g, u, packed_params, mode):
    B, sd = x.shape
    gd, ad = g.shape[1], u.shape[1]
    n_rows = _offsets(sd, gd, ad)[-1]
    assert g.shape[0] == B and u.shape[0] == B
    assert packed_params.shape == (n_rows, _LANES), (
        "packed_params does not match (state_dim, goal_dim, action_dim); "
        "re-pack with pack_critic_params")
    return _build_call(B, sd, gd, ad, mode)(x, g, u, packed_params)


@jax.jit
def critic_forward(x, g, u, packed_params):
    """Twin-Q critic forward. Returns (q1, q2), each (B, 1)."""
    return _critic_call(x, g, u, packed_params, "both")


@jax.jit
def critic_q1(x, g, u, packed_params):
    """Critic.Q1 — same fused kernel, Q1-only output (B, 1)."""
    return _critic_call(x, g, u, packed_params, "q1")


@jax.jit
def critic_min_q(x, g, u, packed_params):
    """min(Q1, Q2), fused in-kernel (convenience for TD-target computation)."""
    return _critic_call(x, g, u, packed_params, "min")


# --------------------------------------------------------------------------- #
# Init + pure-JAX reference (for correctness checking).
# --------------------------------------------------------------------------- #
def init_critic_params(key, state_dim, goal_dim, action_dim, hidden_size=_HIDDEN):
    """PyTorch-style init: U(-1/sqrt(fan_in), 1/sqrt(fan_in))."""
    in_dim = state_dim + goal_dim + action_dim
    shapes = [
        (in_dim, hidden_size), (hidden_size,),
        (hidden_size, hidden_size), (hidden_size,),
        (hidden_size, 1), (1,),
        (in_dim, hidden_size), (hidden_size,),
        (hidden_size, hidden_size), (hidden_size,),
        (hidden_size, 1), (1,),
    ]
    params = []
    keys = jax.random.split(key, len(shapes))
    for k, shp in zip(keys, shapes):
        if len(shp) == 2:
            bound = 1.0 / jnp.sqrt(shp[0])
            p = jax.random.uniform(k, shp, jnp.float32, -bound, bound)
        else:
            fan_in = params[-1].shape[0]
            bound = 1.0 / jnp.sqrt(fan_in)
            p = jax.random.uniform(k, (1, shp[0]), jnp.float32, -bound, bound)
        params.append(p)
    return tuple(params)


def _reference_forward(x, g, u, params):
    (w1, b1, w2, b2, w3, b3, w4, b4, w5, b5, w6, b6) = params
    xu = jnp.concatenate([x, g, u], axis=1)
    h1 = jax.nn.relu(xu @ w1 + b1)
    h1 = jax.nn.relu(h1 @ w2 + b2)
    q1 = h1 @ w3 + b3
    h2 = jax.nn.relu(xu @ w4 + b4)
    h2 = jax.nn.relu(h2 @ w5 + b5)
    q2 = h2 @ w6 + b6
    return q1, q2


if __name__ == "__main__":
    state_dim, goal_dim, action_dim = 6, 3, 2

    key = jax.random.PRNGKey(0)
    kp, kdata = jax.random.split(key, 2)
    params = init_critic_params(kp, state_dim, goal_dim, action_dim)
    packed = pack_critic_params(params, state_dim, goal_dim, action_dim)

    # batch=4 exercises the single-block path; batch=512 exercises the
    # batch-tiled ("parallel") grid path.
    for batch in (4, 512):
        kx, kg, ku = jax.random.split(jax.random.fold_in(kdata, batch), 3)
        x = jax.random.normal(kx, (batch, state_dim), jnp.float32)
        g = jax.random.normal(kg, (batch, goal_dim), jnp.float32)
        u = jax.random.normal(ku, (batch, action_dim), jnp.float32)

        q1, q2 = jax.block_until_ready(critic_forward(x, g, u, packed))
        q1_only = jax.block_until_ready(critic_q1(x, g, u, packed))
        qmin = jax.block_until_ready(critic_min_q(x, g, u, packed))

        r1, r2 = _reference_forward(x, g, u, params)
        assert q1.shape == (batch, 1) and q2.shape == (batch, 1)
        assert q1_only.shape == (batch, 1) and qmin.shape == (batch, 1)
        assert jnp.allclose(q1, r1, atol=1e-4), "q1 mismatch vs reference"
        assert jnp.allclose(q2, r2, atol=1e-4), "q2 mismatch vs reference"
        assert jnp.allclose(q1_only, r1, atol=1e-4), "Q1-only mismatch vs reference"
        assert jnp.allclose(qmin, jnp.minimum(r1, r2), atol=1e-4), "min-Q mismatch"

    print("KERNEL_OK")
</pallas_src>

<mosaic_0001>
module attributes {stable_mosaic.version = 11 : i64} {
  func.func @kernel(%arg0: i32, %arg1: memref<4x6xf32, #tpu.memory_space<vmem>>, %arg2: memref<4x3xf32, #tpu.memory_space<vmem>>, %arg3: memref<4x2xf32, #tpu.memory_space<vmem>>, %arg4: memref<288x128xf32, #tpu.memory_space<vmem>>, %arg5: memref<4x1xf32, #tpu.memory_space<vmem>>, %arg6: memref<4x1xf32, #tpu.memory_space<vmem>>, %arg7: memref<4x24xf32, #tpu.memory_space<vmem>>) attributes {dimension_semantics = [#tpu.dimension_semantics<parallel>], iteration_bounds = array<i64: 1>, scalar_prefetch = 0 : i64, scratch_operands = 1 : i64, tpu.core_type = #tpu.core_type<tc>, window_params = [{transform_indices = @transform_0, window_bounds = array<i64: 4, 6>}, {transform_indices = @transform_1, window_bounds = array<i64: 4, 3>}, {transform_indices = @transform_2, window_bounds = array<i64: 4, 2>}, {pipeline_mode = #tpu.pipeline_mode<synchronous>, transform_indices = @transform_3, window_bounds = array<i64: 288, 128>}, {transform_indices = @transform_4, window_bounds = array<i64: 4, 1>}, {transform_indices = @transform_5, window_bounds = array<i64: 4, 1>}]} {
    %cst = arith.constant 0.000000e+00 : f32
    %0 = vector.broadcast %cst : f32 to vector<4x24xf32>
    %c0 = arith.constant 0 : index
    %c0_0 = arith.constant 0 : index
    %1 = vector.load %arg7[%c0, %c0_0] : memref<4x24xf32, #tpu.memory_space<vmem>>, vector<4x24xf32>
    tpu.vector_store %arg7[%c0, %c0_0], %0 {strides = array<i32>} : memref<4x24xf32, #tpu.memory_space<vmem>>, vector<4x24xf32>,
    %c0_1 = arith.constant 0 : index
    %c0_2 = arith.constant 0 : index
    %2 = vector.load %arg1[%c0_1, %c0_2] : memref<4x6xf32, #tpu.memory_space<vmem>>, vector<4x6xf32>
    %c0_3 = arith.constant 0 : index
    %c0_4 = arith.constant 0 : index
    %3 = vector.load %arg7[%c0_3, %c0_4] : memref<4x24xf32, #tpu.memory_space<vmem>>, vector<4x6xf32>
    tpu.vector_store %arg7[%c0_3, %c0_4], %2 {strides = array<i32>} : memref<4x24xf32, #tpu.memory_space<vmem>>, vector<4x6xf32>,
    %c0_5 = arith.constant 0 : index
    %c0_6 = arith.constant 0 : index
    %4 = vector.load %arg2[%c0_5, %c0_6] : memref<4x3xf32, #tpu.memory_space<vmem>>, vector<4x3xf32>
    %c0_7 = arith.constant 0 : index
    %c8 = arith.constant 8 : index
    %5 = vector.load %arg7[%c0_7, %c8] : memref<4x24xf32, #tpu.memory_space<vmem>>, vector<4x3xf32>
    tpu.vector_store %arg7[%c0_7, %c8], %4 {strides = array<i32>} : memref<4x24xf32, #tpu.memory_space<vmem>>, vector<4x3xf32>,
    %c0_8 = arith.constant 0 : index
    %c0_9 = arith.constant 0 : index
    %6 = vector.load %arg3[%c0_8, %c0_9] : memref<4x2xf32, #tpu.memory_space<vmem>>, vector<4x2xf32>
    %c0_10 = arith.constant 0 : index
    %c16 = arith.constant 16 : index
    %7 = vector.load %arg7[%c0_10, %c16] : memref<4x24xf32, #tpu.memory_space<vmem>>, vector<4x2xf32>
    tpu.vector_store %arg7[%c0_10, %c16], %6 {strides = array<i32>} : memref<4x24xf32, #tpu.memory_space<vmem>>, vector<4x2xf32>,
    %c0_11 = arith.constant 0 : index
    %c0_12 = arith.constant 0 : index
    %8 = vector.load %arg4[%c0_11, %c0_12] : memref<288x128xf32, #tpu.memory_space<vmem>>, vector<24x128xf32>
    %c24 = arith.constant 24 : index
    %c0_13 = arith.constant 0 : index
    %9 = vector.load %arg4[%c24, %c0_13] : memref<288x128xf32, #tpu.memory_space<vmem>>, vector<128x128xf32>
    %c152 = arith.constant 152 : index
    %c0_14 = arith.constant 0 : index
    %10 = vector.load %arg4[%c152, %c0_14] : memref<288x128xf32, #tpu.memory_space<vmem>>, vector<128x128xf32>
    %c280 = arith.constant 280 : index
    %c0_15 = arith.constant 0 : index
    %11 = vector.load %arg4[%c280, %c0_15] : memref<288x128xf32, #tpu.memory_space<vmem>>, vector<1x128xf32>
    %c281 = arith.constant 281 : index
    %c0_16 = arith.constant 0 : index
    %12 = vector.load %arg4[%c281, %c0_16] : memref<288x128xf32, #tpu.memory_space<vmem>>, vector<1x128xf32>
    %c282 = arith.constant 282 : index
    %c0_17 = arith.constant 0 : index
    %13 = vector.load %arg4[%c282, %c0_17] : memref<288x128xf32, #tpu.memory_space<vmem>>, vector<1x128xf32>
    %c0_18 = arith.constant 0 : index
    %c0_19 = arith.constant 0 : index
    %14 = vector.load %arg7[%c0_18, %c0_19] : memref<4x24xf32, #tpu.memory_space<vmem>>, vector<4x24xf32>
    %cst_20 = arith.constant dense<0.000000e+00> : vector<4x128xf32>
    %15 = tpu.matmul %14, %8, %cst_20 {dimension_numbers = #tpu.dot_dimension_numbers<[1], [0], [0], [1], [0, 0, 1, 1], [], []>} : vector<4x24xf32>, vector<24x128xf32>, vector<4x128xf32> -> vector<4x128xf32>
    %16 = vector.broadcast %11 : vector<1x128xf32> to vector<4x128xf32>
    %17 = arith.addf %15, %16 : vector<4x128xf32>
    %cst_21 = arith.constant 0.000000e+00 : f32
    %18 = vector.broadcast %cst_21 : f32 to vector<4x128xf32>
    %19 = arith.maximumf %17, %18 : vector<4x128xf32>
    %cst_22 = arith.constant dense<0.000000e+00> : vector<4x128xf32>
    %20 = tpu.matmul %19, %9, %cst_22 {dimension_numbers = #tpu.dot_dimension_numbers<[1], [0], [0], [1], [0, 0, 1, 1], [], []>} : vector<4x128xf32>, vector<128x128xf32>, vector<4x128xf32> -> vector<4x128xf32>
    %21 = vector.broadcast %12 : vector<1x128xf32> to vector<4x128xf32>
    %22 = arith.addf %20, %21 : vector<4x128xf32>
    %cst_23 = arith.constant 0.000000e+00 : f32
    %23 = vector.broadcast %cst_23 : f32 to vector<4x128xf32>
    %24 = arith.maximumf %22, %23 : vector<4x128xf32>
    %cst_24 = arith.constant dense<0.000000e+00> : vector<4x128xf32>
    %25 = tpu.matmul %24, %10, %cst_24 {dimension_numbers = #tpu.dot_dimension_numbers<[1], [0], [0], [1], [0, 0, 1, 1], [], []>} : vector<4x128xf32>, vector<128x128xf32>, vector<4x128xf32> -> vector<4x128xf32>
    %26 = vector.broadcast %13 : vector<1x128xf32> to vector<4x128xf32>
    %27 = arith.addf %25, %26 : vector<4x128xf32>
    %28 = vector.extract_strided_slice %27 {offsets = [0, 0], sizes = [4, 1], strides = [1, 1]} : vector<4x128xf32> to vector<4x1xf32>
    %c0_25 = arith.constant 0 : index
    %c0_26 = arith.constant 0 : index
    %29 = vector.load %arg5[%c0_25, %c0_26] : memref<4x1xf32, #tpu.memory_space<vmem>>, vector<4x1xf32>
    tpu.vector_store %arg5[%c0_25, %c0_26], %28 {strides = array<i32>} : memref<4x1xf32, #tpu.memory_space<vmem>>, vector<4x1xf32>,
    %30 = vector.extract_strided_slice %27 {offsets = [0, 1], sizes = [4, 1], strides = [1, 1]} : vector<4x128xf32> to vector<4x1xf32>
    %c0_27 = arith.constant 0 : index
    %c0_28 = arith.constant 0 : index
    %31 = vector.load %arg6[%c0_27, %c0_28] : memref<4x1xf32, #tpu.memory_space<vmem>>, vector<4x1xf32>
    tpu.vector_store %arg6[%c0_27, %c0_28], %30 {strides = array<i32>} : memref<4x1xf32, #tpu.memory_space<vmem>>, vector<4x1xf32>,
    return
  }
  func.func @transform_0(%arg0: i32) -> (i32, i32) {
    %c0_i32 = arith.constant 0 : i32
    %c0_i32_0 = arith.constant 0 : i32
    return %arg0, %c0_i32 : i32, i32
  }
  func.func @transform_1(%arg0: i32) -> (i32, i32) {
    %c0_i32 = arith.constant 0 : i32
    %c0_i32_0 = arith.constant 0 : i32
    return %arg0, %c0_i32 : i32, i32
  }
  func.func @transform_2(%arg0: i32) -> (i32, i32) {
    %c0_i32 = arith.constant 0 : i32
    %c0_i32_0 = arith.constant 0 : i32
    return %arg0, %c0_i32 : i32, i32
  }
  func.func @transform_3(%arg0: i32) -> (i32, i32) {
    %c0_i32 = arith.constant 0 : i32
    %c0_i32_0 = arith.constant 0 : i32
    %c0_i32_1 = arith.constant 0 : i32
    return %c0_i32, %c0_i32_0 : i32, i32
  }
  func.func @transform_4(%arg0: i32) -> (i32, i32) {
    %c0_i32 = arith.constant 0 : i32
    %c0_i32_0 = arith.constant 0 : i32
    return %arg0, %c0_i32 : i32, i32
  }
  func.func @transform_5(%arg0: i32) -> (i32, i32) {
    %c0_i32 = arith.constant 0 : i32
    %c0_i32_0 = arith.constant 0 : i32
    return %arg0, %c0_i32 : i32, i32
  }
}

</mosaic_0001>

<bundles_post_ra>
// kernel: critic_forward.1
= control target key start
LH: loop header
LB: loop body
LE: loop exit
PB: predicated region body
PF: predicated region fallthrough
CT: control target
= control target key end

     0   :  { %11 = vsyncpa [#allocation4], 0  ;;  %s539_s18 = smov [#allocation3]   ;;  %s629_s0 = inlined_call_operand.vmem [shape: f32[4,6], index: 0, kind: input, shape index: {}]   ;;  %s630_s1 = inlined_call_operand.vmem [shape: f32[4,3], index: 1, kind: input, shape index: {}]   ;;  %s631_s2 = inlined_call_operand.vmem [shape: f32[4,2], index: 2, kind: input, shape index: {}]   ;;  %s632_s3 = inlined_call_operand.hbm [shape: f32[288,128], index: 3, kind: input, shape index: {}]   ;;  %s633_s4 = inlined_call_operand.vmem [shape: f32[4,1], index: 4, kind: output, shape index: {0}]   ;;  %s634_s5 = inlined_call_operand.vmem [shape: f32[4,1], index: 5, kind: output, shape index: {1}]  }
   0x1   :  { %s23_s19 = sshll.u32 %s539_s18, 4  ;;  %s515_s22 = scalar_lea.hbm %s632_s3, 4608  ;;  %s24_s19 = int_to_ptr.vmem [resolvable:$true] %s23_s19 }
   0x2   :  { %p516_p0 = scmp.ne.s32.totalorder %s632_s3, %s515_s22  ;;  %p519_p1 = scmp.lt.u32.totalorder %s515_s22, %s632_s3 }
   0x4   :  { %p521_p2 = pnand %p519_p1, %p516_p0 }
   0x6   :  { %524 = shalt.err (!%p521_p2)
}
   0x7   :  { %s525_s27 = scalar_lea.vmem %s24_s19, 4608  ;;  %p530_p4 = scmp.lt.s32.totalorder %s24_s19, %s24_s19 }
   0x8   :  { %p526_p3 = scmp.ne.s32.totalorder %s24_s19, %s525_s27  ;;  %p531_p5 = scmp.lt.s32.totalorder %s525_s27, %s525_s27 }
   0xa   :  { %p532_p6 = por %p531_p5, %p530_p4 }
   0xc   :  { %p533_p7 = pnand %p532_p6, %p526_p3 }
   0xe   :  { %536 = shalt.err (!%p533_p7)
}
   0xf   :  { %s540_s28 = smov 128   ;;  %s541_s29 = smov 8  }
  0x10   :  { %29 = dma.hbm_to_vmem [thread:$0]  %s632_s3, 4608, %s24_s19, [#allocation4], %s540_s28, %s540_s28, %s541_s29  }
  0x11   :  { %537 = dma.done.wait [#allocation4], 4608  }
  0x12   :  { %538 = vsyncadd [#allocation4], 4294962688  ;;  %vm33_vm0 = vcmask 191488   ;;  %v542_v0 = vmov 0.0   ;;  %v543_v1 = vmov 0.0|0.0   ;;  %vm544_vm1 = vmmov 0  }
  0x13   :  { %34 = vst.msk [vmem:[#allocation2] sm:$0xf] %vm33_vm0, %v542_v0  ;;  %456 = vmatprep.subr.bf16.mxu0 %v543_v1  ;;  %383 = vmatprep.mubr.msk.f32.mxu0 %vm544_vm1, %v542_v0  ;;  %vm36_vm2 = vcmask 44032   ;;  %v38_v2 = vld [vmem:[%s630_s1] sm:$0xf]  ;;  %v52_v4 = vld [vmem:[#allocation3] sm:$0xff] }
  0x14   :  { %459 = vmatprep.subr.bf16.mxu1 %v543_v1  ;;  %418 = vmatprep.mubr.msk.f32.mxu1 %vm544_vm1, %v542_v0  ;;  %v35_v3 = vld [vmem:[%s629_s0] sm:$0xf]  ;;  %v53_v5 = vld [vmem:[#allocation3 + $0x8] sm:$0xff]  ;;  %v56_v9 = vld [vmem:[#allocation3 + $0x20] sm:$0xff]  ;;  %s545_s1 = smov 16   ;;  %vm43_vm3 = vcmask 85056  }
  0x15   :  { %40 = vrot.lane.b32.xlu0 %v38_v2, %s541_s29  ;;  %37 = vst.msk [vmem:[#allocation2] sm:$0xf] %vm36_vm2, %v35_v3  ;;  %v45_v6 = vld [vmem:[%s631_s2] sm:$0xf]  ;;  %v457_v7 = vpack.c.bf16 %v53_v5, %v52_v4  ;;  %v57_v11 = vld [vmem:[#allocation3 + $0x28] sm:$0xff]  ;;  %v58_v12 = vld [vmem:[#allocation3 + $0x30] sm:$0xff] }
  0x16   :  { %v55_v8 = vld [vmem:[#allocation3 + $0x18] sm:$0xff]  ;;  %v54_v13 = vld [vmem:[#allocation3 + $0x10] sm:$0xff]  ;;  %v463_v14 = vpack.c.bf16 %v58_v12, %v57_v11  ;;  %v60_v16 = vld [vmem:[#allocation3 + $0x40] sm:$0xff]  ;;  %vm50_vm4 = vcmask 142464   ;;  %vm95_vm5 = vcmask 195584   ;;  %vm319_vm6 = vcmask 3072  }
  0x17   :  { %v460_v10 = vpack.c.bf16 %v56_v9, %v55_v8  ;;  %458 = vmatpush3.bf16.msra.mxu0 %v457_v7  ;;  %v59_v15 = vld [vmem:[#allocation3 + $0x38] sm:$0xff]  ;;  %v61_v18 = vld [vmem:[#allocation3 + $0x48] sm:$0xff]  ;;  %v62_v19 = vld [vmem:[#allocation3 + $0x50] sm:$0xff]  ;;  %s546_s0 = smov 127  }
  0x18   :  { %381 = vmatprep.subr.mxu0 %v542_v0  ;;  %v466_v17 = vpack.c.bf16 %v60_v16, %v59_v15  ;;  %v469_v20 = vpack.c.bf16 %v62_v19, %v61_v18  ;;  %v63_v21 = vld [vmem:[#allocation3 + $0x58] sm:$0xff]  ;;  %v64_v22 = vld [vmem:[#allocation3 + $0x60] sm:$0xff]  ;;  %v65_v24 = vld [vmem:[#allocation3 + $0x68] sm:$0xff] }
  0x19   :  { %47 = vrot.lane.b32.xlu0 %v45_v6, %s545_s1  ;;  %461 = vmatpush3.bf16.msra.mxu1 %v460_v10  ;;  %v472_v23 = vpack.c.bf16 %v64_v22, %v63_v21  ;;  %v66_v25 = vld [vmem:[#allocation3 + $0x70] sm:$0xff]  ;;  %v67_v27 = vld [vmem:[#allocation3 + $0x78] sm:$0xff]  ;;  %v68_v28 = vld [vmem:[#allocation3 + $0x80] sm:$0xff] }
  0x1a   :  { %462 = vmatprep.subr.bf16.mxu1 %v543_v1  ;;  %v475_v26 = vpack.c.bf16 %v66_v25, %v65_v24  ;;  %v478_v29 = vpack.c.bf16 %v68_v28, %v67_v27  ;;  %v69_v33 = vld [vmem:[#allocation3 + $0x88] sm:$0xff]  ;;  %v70_v34 = vld [vmem:[#allocation3 + $0x90] sm:$0xff]  ;;  %v71_v36 = vld [vmem:[#allocation3 + $0x98] sm:$0xff] }
  0x1b   :  { %382 = vmatpush3.msra.mxu0 %v54_v13  ;;  %v481_v35 = vpack.c.bf16 %v70_v34, %v69_v33  ;;  %v72_v37 = vld [vmem:[#allocation3 + $0xa0] sm:$0xff]  ;;  %v73_v38 = vld [vmem:[#allocation3 + $0xa8] sm:$0xff]  ;;  %v74_v40 = vld [vmem:[#allocation3 + $0xb0] sm:$0xff] }
  0x1c   :  { %483 = vmatprep.subr.bf16.mxu0 %v543_v1  ;;  %v484_v39 = vpack.c.bf16 %v72_v37, %v71_v36  ;;  %v487_v41 = vpack.c.bf16 %v74_v40, %v73_v38  ;;  %v75_v42 = vld [vmem:[#allocation3 + $0xb8] sm:$0xff]  ;;  %v76_v43 = vld [vmem:[#allocation3 + $0xc0] sm:$0xff]  ;;  %v77_v45 = vld [vmem:[#allocation3 + $0xc8] sm:$0xff] }
  0x1d   :  { %464 = vmatpush3.bf16.msra.mxu1 %v463_v14  ;;  %v490_v44 = vpack.c.bf16 %v76_v43, %v75_v42  ;;  %v78_v46 = vld [vmem:[#allocation3 + $0xd0] sm:$0xff]  ;;  %v79_v48 = vld [vmem:[#allocation3 + $0xd8] sm:$0xff]  ;;  %v80_v49 = vld [vmem:[#allocation3 + $0xe0] sm:$0xff] }
  0x1e   :  { %465 = vmatprep.subr.bf16.mxu1 %v543_v1  ;;  %v493_v47 = vpack.c.bf16 %v78_v46, %v77_v45  ;;  %v496_v50 = vpack.c.bf16 %v80_v49, %v79_v48  ;;  %v81_v51 = vld [vmem:[#allocation3 + $0xe8] sm:$0xff]  ;;  %v82_v52 = vld [vmem:[#allocation3 + $0xf0] sm:$0xff]  ;;  %v83_v54 = vld [vmem:[#allocation3 + $0xf8] sm:$0xff] }
  0x1f   :  { %v499_v53 = vpack.c.bf16 %v82_v52, %v81_v51  ;;  %v84_v55 = vld [vmem:[#allocation3 + $0x100] sm:$0xff]  ;;  %v335_v57 = vld [vmem:[#allocation3 + $0x118] ss:$0 sm:$0xff]  ;;  %v85_v62 = vld [vmem:[#allocation3 + $0x108] sm:$0xff] }
  0x20   :  { %v502_v56 = vpack.c.bf16 %v84_v55, %v83_v54  ;;  %v86_v63 = vld [vmem:[#allocation3 + $0x110] sm:$0xff]  ;;  %v337_v2 = vld [vmem:[#allocation3 + $0x119] ss:$0 sm:$0xff]  ;;  %v338_v7 = vld [vmem:[#allocation3 + $0x11a] ss:$0 sm:$0xff] }
  0x21   :  { %467 = vmatpush3.bf16.msra.mxu1 %v466_v17 }
  0x22   :  { %468 = vmatprep.subr.bf16.mxu1 %v543_v1 }
  0x25   :  { %470 = vmatpush3.bf16.msra.mxu1 %v469_v20 }
  0x26   :  { %471 = vmatprep.subr.bf16.mxu1 %v543_v1 }
  0x29   :  { %473 = vmatpush3.bf16.msra.mxu1 %v472_v23 }
  0x2a   :  { %474 = vmatprep.subr.bf16.mxu1 %v543_v1 }
  0x2d   :  { %476 = vmatpush3.bf16.msra.mxu1 %v475_v26 }
  0x2e   :  { %477 = vmatprep.subr.bf16.mxu1 %v543_v1 }
  0x31   :  { %479 = vmatpush3.bf16.msra.mxu1 %v478_v29 }
  0x32   :  { %480 = vmatprep.subr.bf16.mxu1 %v543_v1 }
  0x35   :  { %482 = vmatpush3.bf16.msra.mxu1 %v481_v35 }
  0x87   :  { %v41_v30 = vpop.permute.xlu0 %40 }
  0x88   :  { %44 = vst.msk [vmem:[#allocation2] sm:$0xf] %vm43_vm3, %v41_v30 }
  0x8b   :  { %v48_v31 = vpop.permute.xlu0 %47 }
  0x8c   :  { %51 = vst.msk [vmem:[#allocation2] sm:$0xf] %vm50_vm4, %v48_v31 }
  0x93   :  { %v90_v32 = vld [vmem:[#allocation2] sm:$0xf] }
  0x94   :  { %384 = vmatmul.mubr.msk.f32.vlgmr.msra.gmra.mrb[0].mxu0 %vm95_vm5, %v90_v32 }
  0x95   :  { %453 = vmatprep.mubr.msk.f32.mxu0 %vm544_vm1, %v542_v0  ;;  %485 = vmatpush3.bf16.msra.mxu0 %v484_v39  ;;  %v505_v0 = vpack.c.bf16 %v86_v63, %v85_v62 }
  0x96   :  { %486 = vmatprep.subr.bf16.mxu0 %v543_v1 }
  0x99   :  { %488 = vmatpush3.bf16.msra.mxu0 %v487_v41 }
  0x9a   :  { %489 = vmatprep.subr.bf16.mxu0 %v543_v1 }
  0x9d   :  { %491 = vmatpush3.bf16.msra.mxu0 %v490_v44 }
  0x9e   :  { %492 = vmatprep.subr.bf16.mxu0 %v543_v1 }
  0xa1   :  { %494 = vmatpush3.bf16.msra.mxu0 %v493_v47 }
  0xa2   :  { %495 = vmatprep.subr.bf16.mxu0 %v543_v1 }
  0xa5   :  { %497 = vmatpush3.bf16.msra.mxu0 %v496_v50 }
  0xa6   :  { %498 = vmatprep.subr.bf16.mxu0 %v543_v1 }
  0xa9   :  { %500 = vmatpush3.bf16.msra.mxu0 %v499_v53 }
  0xaa   :  { %501 = vmatprep.subr.bf16.mxu0 %v543_v1 }
  0xad   :  { %503 = vmatpush3.bf16.msra.mxu0 %v502_v56 }
  0xae   :  { %504 = vmatprep.subr.bf16.mxu0 %v543_v1 }
  0xb1   :  { %506 = vmatpush3.bf16.msra.mxu0 %v505_v0 }
 0x167   :  { %v165_v58 = vpop.f32.mrb[0].mxu0 }
 0x168   :  { %v166_v59 = vadd.f32 %v335_v57, %v165_v58  ;;  %v385_v60 = vpop.f32.mrb[1].mxu0 }
 0x16a   :  { %v169_v61 = vmax.f32 %v166_v59, 0.0 }
 0x16c   :  { %419 = vmatmul.mubr.f32.vlgmr.msra.gmra.mrb[0].mxu1 %v169_v61 }
 0x23f   :  { %v240_v3 = vpop.f32.mrb[0].mxu1 }
 0x240   :  { %v241_v4 = vadd.f32 %v337_v2, %v240_v3  ;;  %v420_v5 = vpop.f32.mrb[1].mxu1 }
 0x242   :  { %v244_v6 = vmax.f32 %v241_v4, 0.0 }
 0x244   :  { %454 = vmatmul.mubr.f32.vlgmr.msra.gmra.mrb[2].mxu0 %v244_v6 }
 0x317   :  { %v315_v8 = vpop.f32.mrb[2].mxu0 }
 0x318   :  { %v316_v1 = vadd.f32 %v338_v7, %v315_v8  ;;  %v455_v9 = vpop.f32.mrb[3].mxu0 }
 0x31a   :  { %322 = vrot.lane.b32.xlu1 %v316_v1, %s546_s0  ;;  %320 = vst.msk [vmem:[%s633_s4] sm:$0xf] %vm319_vm6, %v316_v1 }
 0x38c   :  { %v323_v10 = vpop.permute.xlu1 %322 }
 0x38d   :  { %325 = vst.msk [vmem:[%s634_s5] sm:$0xf] %vm319_vm6, %v323_v10 }
 0x38e   :  { %334 = vsyncpa [#allocation4], 1 }

</bundles_post_ra>
